<compile_context>
chip_gen: v5e
topology: v5e:2x2
jax: 0.10.0
libtpu: 0.0.40
codegen_flags: <defaults>
</compile_context>

<pallas_src>
import jax
import jax.numpy as jnp
from jax.experimental import pallas as pl
from jax.experimental.pallas import tpu as pltpu


def dueling_dqn_kernel(xT_ref, w1T_ref, w2T_ref, b2T_ref, qT_ref):
    # xT_ref : (n_s, tb)            batch on lanes
    # w1T_ref: (hidden, n_s + 1)    last column = b1
    # w2T_ref: (1 + n_a, hidden)    row 0 = value head, rows 1.. = advantage head
    # b2T_ref: (1 + n_a, 1)         [bv ; ba]
    # qT_ref : (n_a, tb)
    hidden, k1 = w1T_ref.shape
    n_s = k1 - 1

    xT = xT_ref[...]
    w1T = w1T_ref[...]

    # ---- Layer 1 on the VPU: accumulator starts from the bias column, K = n_s FMAs ----
    hT = w1T[:, n_s:n_s + 1] + w1T[:, 0:1] * xT[0:1, :]        # (hidden, tb)
    for k in range(1, n_s):                                    # static unroll
        hT = hT + w1T[:, k:k + 1] * xT[k:k + 1, :]
    hT = jnp.maximum(hT, 0.0)

    # ---- Fused value|advantage head on the MXU, result already lane-major ----
    out = jnp.dot(w2T_ref[...], hT, preferred_element_type=jnp.float32) + b2T_ref[...]

    v = out[0:1, :]                                            # (1, tb)
    a = out[1:, :]                                             # (n_a, tb)
    n_a = qT_ref.shape[0]
    if n_a == 2:
        a_mean = 0.5 * (out[1:2, :] + out[2:3, :])             # explicit 2-term mean
    else:
        a_mean = jnp.sum(a, axis=0, keepdims=True) * (1.0 / n_a)

    # Dueling combine: Q = V + A - mean_a(A)
    qT_ref[...] = (v + a - a_mean).astype(qT_ref.dtype)


def pack_params(params):
    """Pack raw (w1, b1, wv, bv, wa, ba) into the kernel layout.

    Call ONCE per parameter update (not per forward): transposes weights to the
    batch-on-lanes layout, folds b1 into w1, and fuses the value/advantage heads.
    """
    w1, b1, wv, bv, wa, ba = params
    w1T_aug = jnp.concatenate([w1.T, b1.T], axis=1)            # (hidden, n_s + 1)
    w2T = jnp.concatenate([wv, wa], axis=1).T                  # (1 + n_a, hidden)
    b2T = jnp.concatenate([bv, ba], axis=1).T                  # (1 + n_a, 1)
    return (w1T_aug, w2T, b2T)


def dueling_dqn_forward(x, packed_params, *, tile_b=2048):
    """x: (B, n_s) f32; packed_params from pack_params(). Returns (B, n_a)."""
    w1T_aug, w2T, b2T = packed_params
    B, n_s = x.shape
    hidden = w1T_aug.shape[0]
    n_a = w2T.shape[0] - 1

    # Batch on the lane axis. In a real training loop, produce x already transposed
    # (or let XLA fuse this into the producer); done here for a self-contained demo.
    xT = x.T                                                   # (n_s, B)

    tb = max(128, (tile_b // 128) * 128)                       # lane-aligned tile
    if B <= tb:
        # Single full-extent block: legal for any B, VMEM footprint bounded by tile_b.
        tb = B
        B_pad = B
    else:
        # Pad up to a tile multiple and pipeline over the grid (both TCs on v7x).
        B_pad = pl.cdiv(B, tb) * tb
        if B_pad != B:
            xT = jnp.pad(xT, ((0, 0), (0, B_pad - B)))
    grid = (B_pad // tb,)

    qT = pl.pallas_call(
        dueling_dqn_kernel,
        out_shape=jax.ShapeDtypeStruct((n_a, B_pad), x.dtype),
        grid=grid,
        in_specs=[
            pl.BlockSpec((n_s, tb), lambda i: (0, i)),           # xT tile, streamed
            pl.BlockSpec((hidden, n_s + 1), lambda i: (0, 0)),   # weights resident
            pl.BlockSpec((1 + n_a, hidden), lambda i: (0, 0)),
            pl.BlockSpec((1 + n_a, 1), lambda i: (0, 0)),
        ],
        out_specs=pl.BlockSpec((n_a, tb), lambda i: (0, i)),     # lane-dense q store
        compiler_params=pltpu.CompilerParams(
            dimension_semantics=("parallel",),                   # batch shards across TCs
        ),
    )(xT, w1T_aug, w2T, b2T)

    return qT[:, :B].T                                           # tiny (n_a, B) transpose


def init_params(key, n_s=4, hidden=32, n_a=2):
    ks = jax.random.split(key, 6)
    scale = 0.1
    w1 = scale * jax.random.normal(ks[0], (n_s, hidden), jnp.float32)
    b1 = scale * jax.random.normal(ks[1], (1, hidden), jnp.float32)
    wv = scale * jax.random.normal(ks[2], (hidden, 1), jnp.float32)
    bv = scale * jax.random.normal(ks[3], (1, 1), jnp.float32)
    wa = scale * jax.random.normal(ks[4], (hidden, n_a), jnp.float32)
    ba = scale * jax.random.normal(ks[5], (1, n_a), jnp.float32)
    return (w1, b1, wv, bv, wa, ba)


def reference_forward(x, params):
    w1, b1, wv, bv, wa, ba = params
    h = jnp.maximum(x @ w1 + b1, 0.0)
    v = h @ wv + bv
    a = h @ wa + ba
    return v + a - jnp.mean(a, axis=1, keepdims=True)


# TODO(synk): target-network copy (update), epsilon-greedy response() and train_model()
# are host-side / optimizer logic with no Pallas equivalent; only forward is implemented.

if __name__ == "__main__":
    key = jax.random.PRNGKey(0)
    k_x, k_p, k_x2 = jax.random.split(key, 3)

    B, n_s, hidden, n_a = 8, 4, 32, 2
    params = init_params(k_p, n_s=n_s, hidden=hidden, n_a=n_a)
    packed = pack_params(params)   # hoisted: pack once per parameter update

    # Small (single-env) batch: single full-extent block.
    x = jax.random.normal(k_x, (B, n_s), jnp.float32)
    q = jax.block_until_ready(dueling_dqn_forward(x, packed))
    q_ref = reference_forward(x, params)
    assert q.shape == (B, n_a)
    assert jnp.allclose(q, q_ref, atol=1e-5, rtol=1e-5), "mismatch vs reference (B=8)"

    # Replay-sized non-divisible batch: exercises padded multi-step grid path.
    B2 = 333
    x2 = jax.random.normal(k_x2, (B2, n_s), jnp.float32)
    q2 = jax.block_until_ready(dueling_dqn_forward(x2, packed, tile_b=128))
    q2_ref = reference_forward(x2, params)
    assert q2.shape == (B2, n_a)
    assert jnp.allclose(q2, q2_ref, atol=1e-5, rtol=1e-5), "mismatch vs reference (B=333)"

    print("KERNEL_OK")
</pallas_src>

<mosaic_0001>
module attributes {stable_mosaic.version = 11 : i64} {
  func.func @dueling_dqn_kernel(%arg0: i32, %arg1: memref<4x8xf32, #tpu.memory_space<vmem>>, %arg2: memref<32x5xf32, #tpu.memory_space<vmem>>, %arg3: memref<3x32xf32, #tpu.memory_space<vmem>>, %arg4: memref<3x1xf32, #tpu.memory_space<vmem>>, %arg5: memref<2x8xf32, #tpu.memory_space<vmem>>) attributes {dimension_semantics = [#tpu.dimension_semantics<parallel>], iteration_bounds = array<i64: 1>, scalar_prefetch = 0 : i64, scratch_operands = 0 : i64, tpu.core_type = #tpu.core_type<tc>, window_params = [{transform_indices = @transform_0, window_bounds = array<i64: 4, 8>}, {pipeline_mode = #tpu.pipeline_mode<synchronous>, transform_indices = @transform_1, window_bounds = array<i64: 32, 5>}, {pipeline_mode = #tpu.pipeline_mode<synchronous>, transform_indices = @transform_2, window_bounds = array<i64: 3, 32>}, {pipeline_mode = #tpu.pipeline_mode<synchronous>, transform_indices = @transform_3, window_bounds = array<i64: 3, 1>}, {transform_indices = @transform_4, window_bounds = array<i64: 2, 8>}]} {
    %c0 = arith.constant 0 : index
    %c0_0 = arith.constant 0 : index
    %0 = vector.load %arg1[%c0, %c0_0] : memref<4x8xf32, #tpu.memory_space<vmem>>, vector<4x8xf32>
    %c0_1 = arith.constant 0 : index
    %c0_2 = arith.constant 0 : index
    %1 = vector.load %arg2[%c0_1, %c0_2] : memref<32x5xf32, #tpu.memory_space<vmem>>, vector<32x5xf32>
    %2 = vector.extract_strided_slice %1 {offsets = [0, 4], sizes = [32, 1], strides = [1, 1]} : vector<32x5xf32> to vector<32x1xf32>
    %3 = vector.extract_strided_slice %1 {offsets = [0, 0], sizes = [32, 1], strides = [1, 1]} : vector<32x5xf32> to vector<32x1xf32>
    %4 = vector.extract_strided_slice %0 {offsets = [0, 0], sizes = [1, 8], strides = [1, 1]} : vector<4x8xf32> to vector<1x8xf32>
    %5 = vector.broadcast %3 : vector<32x1xf32> to vector<32x8xf32>
    %6 = vector.broadcast %4 : vector<1x8xf32> to vector<32x8xf32>
    %7 = arith.mulf %5, %6 : vector<32x8xf32>
    %8 = vector.broadcast %2 : vector<32x1xf32> to vector<32x8xf32>
    %9 = arith.addf %8, %7 : vector<32x8xf32>
    %10 = vector.extract_strided_slice %1 {offsets = [0, 1], sizes = [32, 1], strides = [1, 1]} : vector<32x5xf32> to vector<32x1xf32>
    %11 = vector.extract_strided_slice %0 {offsets = [1, 0], sizes = [1, 8], strides = [1, 1]} : vector<4x8xf32> to vector<1x8xf32>
    %12 = vector.broadcast %10 : vector<32x1xf32> to vector<32x8xf32>
    %13 = vector.broadcast %11 : vector<1x8xf32> to vector<32x8xf32>
    %14 = arith.mulf %12, %13 : vector<32x8xf32>
    %15 = arith.addf %9, %14 : vector<32x8xf32>
    %16 = vector.extract_strided_slice %1 {offsets = [0, 2], sizes = [32, 1], strides = [1, 1]} : vector<32x5xf32> to vector<32x1xf32>
    %17 = vector.extract_strided_slice %0 {offsets = [2, 0], sizes = [1, 8], strides = [1, 1]} : vector<4x8xf32> to vector<1x8xf32>
    %18 = vector.broadcast %16 : vector<32x1xf32> to vector<32x8xf32>
    %19 = vector.broadcast %17 : vector<1x8xf32> to vector<32x8xf32>
    %20 = arith.mulf %18, %19 : vector<32x8xf32>
    %21 = arith.addf %15, %20 : vector<32x8xf32>
    %22 = vector.extract_strided_slice %1 {offsets = [0, 3], sizes = [32, 1], strides = [1, 1]} : vector<32x5xf32> to vector<32x1xf32>
    %23 = vector.extract_strided_slice %0 {offsets = [3, 0], sizes = [1, 8], strides = [1, 1]} : vector<4x8xf32> to vector<1x8xf32>
    %24 = vector.broadcast %22 : vector<32x1xf32> to vector<32x8xf32>
    %25 = vector.broadcast %23 : vector<1x8xf32> to vector<32x8xf32>
    %26 = arith.mulf %24, %25 : vector<32x8xf32>
    %27 = arith.addf %21, %26 : vector<32x8xf32>
    %cst = arith.constant 0.000000e+00 : f32
    %28 = vector.broadcast %cst : f32 to vector<32x8xf32>
    %29 = arith.maximumf %27, %28 : vector<32x8xf32>
    %c0_3 = arith.constant 0 : index
    %c0_4 = arith.constant 0 : index
    %30 = vector.load %arg3[%c0_3, %c0_4] : memref<3x32xf32, #tpu.memory_space<vmem>>, vector<3x32xf32>
    %cst_5 = arith.constant dense<0.000000e+00> : vector<3x8xf32>
    %31 = tpu.matmul %30, %29, %cst_5 {dimension_numbers = #tpu.dot_dimension_numbers<[1], [0], [0], [1], [0, 0, 1, 1], [], []>} : vector<3x32xf32>, vector<32x8xf32>, vector<3x8xf32> -> vector<3x8xf32>
    %c0_6 = arith.constant 0 : index
    %c0_7 = arith.constant 0 : index
    %32 = vector.load %arg4[%c0_6, %c0_7] : memref<3x1xf32, #tpu.memory_space<vmem>>, vector<3x1xf32>
    %33 = vector.broadcast %32 : vector<3x1xf32> to vector<3x8xf32>
    %34 = arith.addf %31, %33 : vector<3x8xf32>
    %35 = vector.extract_strided_slice %34 {offsets = [0, 0], sizes = [1, 8], strides = [1, 1]} : vector<3x8xf32> to vector<1x8xf32>
    %36 = vector.extract_strided_slice %34 {offsets = [1, 0], sizes = [2, 8], strides = [1, 1]} : vector<3x8xf32> to vector<2x8xf32>
    %37 = vector.extract_strided_slice %34 {offsets = [1, 0], sizes = [1, 8], strides = [1, 1]} : vector<3x8xf32> to vector<1x8xf32>
    %38 = vector.extract_strided_slice %34 {offsets = [2, 0], sizes = [1, 8], strides = [1, 1]} : vector<3x8xf32> to vector<1x8xf32>
    %39 = arith.addf %37, %38 : vector<1x8xf32>
    %cst_8 = arith.constant 5.000000e-01 : f32
    %40 = vector.broadcast %cst_8 : f32 to vector<1x8xf32>
    %41 = arith.mulf %40, %39 : vector<1x8xf32>
    %42 = vector.broadcast %35 : vector<1x8xf32> to vector<2x8xf32>
    %43 = arith.addf %42, %36 : vector<2x8xf32>
    %44 = vector.broadcast %41 : vector<1x8xf32> to vector<2x8xf32>
    %45 = arith.subf %43, %44 : vector<2x8xf32>
    %c0_9 = arith.constant 0 : index
    %c0_10 = arith.constant 0 : index
    %46 = vector.load %arg5[%c0_9, %c0_10] : memref<2x8xf32, #tpu.memory_space<vmem>>, vector<2x8xf32>
    tpu.vector_store %arg5[%c0_9, %c0_10], %45 {strides = array<i32>} : memref<2x8xf32, #tpu.memory_space<vmem>>, vector<2x8xf32>,
    return
  }
  func.func @transform_0(%arg0: i32) -> (i32, i32) {
    %c0_i32 = arith.constant 0 : i32
    %c0_i32_0 = arith.constant 0 : i32
    return %c0_i32, %arg0 : i32, i32
  }
  func.func @transform_1(%arg0: i32) -> (i32, i32) {
    %c0_i32 = arith.constant 0 : i32
    %c0_i32_0 = arith.constant 0 : i32
    %c0_i32_1 = arith.constant 0 : i32
    return %c0_i32, %c0_i32_0 : i32, i32
  }
  func.func @transform_2(%arg0: i32) -> (i32, i32) {
    %c0_i32 = arith.constant 0 : i32
    %c0_i32_0 = arith.constant 0 : i32
    %c0_i32_1 = arith.constant 0 : i32
    return %c0_i32, %c0_i32_0 : i32, i32
  }
  func.func @transform_3(%arg0: i32) -> (i32, i32) {
    %c0_i32 = arith.constant 0 : i32
    %c0_i32_0 = arith.constant 0 : i32
    %c0_i32_1 = arith.constant 0 : i32
    return %c0_i32, %c0_i32_0 : i32, i32
  }
  func.func @transform_4(%arg0: i32) -> (i32, i32) {
    %c0_i32 = arith.constant 0 : i32
    %c0_i32_0 = arith.constant 0 : i32
    return %c0_i32, %arg0 : i32, i32
  }
}

</mosaic_0001>

<bundles_post_ra>
// kernel: tpu_custom_call.1
= control target key start
LH: loop header
LB: loop body
LE: loop exit
PB: predicated region body
PF: predicated region fallthrough
CT: control target
= control target key end

     0   :  { %v259_v2 = vmov 4   ;;  %v260_v3 = vmov 0   ;;  %s314_s0 = inlined_call_operand.vmem [shape: f32[4,8], index: 0, kind: input, shape index: {}]   ;;  %s315_s1 = inlined_call_operand.vmem [shape: f32[32,5], index: 1, kind: input, shape index: {}]   ;;  %s316_s2 = inlined_call_operand.vmem [shape: f32[3,32], index: 2, kind: input, shape index: {}]   ;;  %s317_s3 = inlined_call_operand.vmem [shape: f32[3,1], index: 3, kind: input, shape index: {}]   ;;  %s318_s4 = inlined_call_operand.hbm [shape: f32[2,8], index: 4, kind: output, shape index: {}]  }
   0x1   :  { %v22_v0 = vld [vmem:[%s315_s1 + $0x18] sm:$0xff]  ;;  %v20_v1 = vld [vmem:[%s315_s1 + $0x8] sm:$0xff]  ;;  %213 = vset.pattern.permute.xlu1 %v259_v2  ;;  %212 = vset.pattern.permute.xlu0 %v260_v3 }
   0x2   :  { %9 = vsyncpa [#allocation3], 0  ;;  %215 = vset.pattern.permute.xlu2 %v260_v3  ;;  %61 = vperm.xlu1 %213, %v22_v0   ;;  %v21_v4 = vld [vmem:[%s315_s1 + $0x10] sm:$0xff]  ;;  %v261_v5 = vmov 1   ;;  %v262_v6 = vmov 2   ;;  %v19_v7 = vld [vmem:[%s315_s1] sm:$0xff] }
   0x3   :  { %40 = vperm.xlu0 %212, %v22_v0   ;;  %30 = vperm.xlu2 %215, %v20_v1   ;;  %v263_v8 = vmov 3   ;;  %v18_v20 = vld [vmem:[%s314_s0] sm:$0xf]  ;;  %vm154_vm0 = vcmask 261120   ;;  %s264_s26 = smov [#allocation2]   ;;  %s196_s30 = sshll.u32 %s318_s4, 4  ;;  %s197_s30 = int_to_ptr.hbm [resolvable:$true] %s196_s30 }
   0x4   :  { %v43_v21 = vperm.slane %v18_v20, 0  ;;  %v84_v23 = vperm.slane %v18_v20, 1  ;;  %v109_v29 = vperm.slane %v18_v20, 2  ;;  %v134_v40 = vperm.slane %v18_v20, 3  ;;  %v148_v54 = vld [vmem:[%s317_s3] sm:$0x7] }
   0x5   :  { %s194_s27 = sshll.u32 %s264_s26, 4  ;;  %vm187_vm1 = vcmask 59393   ;;  %s195_s27 = int_to_ptr.vmem [resolvable:$true] %s194_s27 }
   0xa   :  { %214 = vset.pattern.permute.xlu1 %v261_v5 }
   0xb   :  { %35 = vperm.xlu0 %212, %v21_v4   ;;  %81 = vperm.xlu1 %214, %v22_v0  }
   0xc   :  { %216 = vset.pattern.permute.xlu2 %v259_v2 }
   0xd   :  { %57 = vperm.xlu2 %216, %v21_v4  }
  0x13   :  { %217 = vset.pattern.permute.xlu0 %v261_v5  ;;  %218 = vset.pattern.permute.xlu1 %v262_v6 }
  0x14   :  { %77 = vperm.xlu0 %217, %v21_v4   ;;  %106 = vperm.xlu1 %218, %v22_v0  }
  0x15   :  { %219 = vset.pattern.permute.xlu2 %v260_v3 }
  0x16   :  { %25 = vperm.xlu2 %219, %v19_v7  }
  0x1c   :  { %222 = vset.pattern.permute.xlu0 %v262_v6  ;;  %220 = vset.pattern.permute.xlu1 %v259_v2 }
  0x1d   :  { %102 = vperm.xlu0 %222, %v21_v4   ;;  %53 = vperm.xlu1 %220, %v20_v1  }
  0x1e   :  { %221 = vset.pattern.permute.xlu2 %v261_v5 }
  0x1f   :  { %73 = vperm.xlu2 %221, %v20_v1  }
  0x25   :  { %227 = vset.pattern.permute.xlu0 %v263_v8  ;;  %223 = vset.pattern.permute.xlu1 %v263_v8 }
  0x26   :  { %127 = vperm.xlu0 %227, %v21_v4   ;;  %131 = vperm.xlu1 %223, %v22_v0  }
  0x27   :  { %224 = vset.pattern.permute.xlu2 %v259_v2 }
  0x28   :  { %49 = vperm.xlu2 %224, %v19_v7  }
  0x2e   :  { %225 = vset.pattern.permute.xlu1 %v261_v5  ;;  %232 = vset.pattern.permute.xlu0 %v260_v3 }
  0x2f   :  { %69 = vperm.xlu1 %225, %v19_v7  }
  0x30   :  { %226 = vset.pattern.permute.xlu2 %v262_v6 }
  0x31   :  { %98 = vperm.xlu2 %226, %v20_v1  }
  0x37   :  { %228 = vset.pattern.permute.xlu1 %v262_v6 }
  0x38   :  { %94 = vperm.xlu1 %228, %v19_v7  }
  0x39   :  { %229 = vset.pattern.permute.xlu2 %v263_v8 }
  0x3a   :  { %123 = vperm.xlu2 %229, %v20_v1  }
  0x40   :  { %230 = vset.pattern.permute.xlu1 %v263_v8 }
  0x41   :  { %119 = vperm.xlu1 %230, %v19_v7   ;;  %v147_v7 = vld [vmem:[%s316_s2] sm:$0x7] }
  0x42   :  { %231 = vset.pattern.permute.xlu2 %v260_v3 }
  0x43   :  { %151 = vperm.xlu2 %231, %v148_v54  }
  0x5d   :  { %v31_v9 = vpop.permute.xlu2 %30 }
  0x5e   :  { %v45_v25 = vmul.f32 %v43_v21, %v31_v9 }
  0x67   :  { %v58_v10 = vpop.permute.xlu2 %57 }
  0x70   :  { %v26_v11 = vpop.permute.xlu2 %25 }
  0x71   :  { %v44_v61 = vmul.f32 %v43_v21, %v26_v11 }
  0x74   :  { %v62_v12 = vpop.permute.xlu1 %61 }
  0x75   :  { %v41_v13 = vpop.permute.xlu0 %40 }
  0x76   :  { %v47_v28 = vmul.f32 %v43_v21, %v41_v13 }
  0x78   :  { %v67_v35 = vadd.f32 %v62_v12, %v47_v28 }
  0x79   :  { %v74_v14 = vpop.permute.xlu2 %73 }
  0x7a   :  { %v86_v30 = vmul.f32 %v84_v23, %v74_v14 }
  0x7d   :  { %v82_v15 = vpop.permute.xlu1 %81  ;;  %v36_v16 = vpop.permute.xlu0 %35 }
  0x7e   :  { %v46_v24 = vmul.f32 %v43_v21, %v36_v16  ;;  %v88_v32 = vmul.f32 %v84_v23, %v82_v15 }
  0x80   :  { %v66_v33 = vadd.f32 %v58_v10, %v46_v24  ;;  %v92_v41 = vadd.f32 %v88_v32, %v67_v35 }
  0x82   :  { %v50_v17 = vpop.permute.xlu2 %49 }
  0x83   :  { %v64_v63 = vadd.f32 %v50_v17, %v44_v61 }
  0x86   :  { %v78_v18 = vpop.permute.xlu0 %77  ;;  %v107_v19 = vpop.permute.xlu1 %106 }
  0x87   :  { %v87_v34 = vmul.f32 %v84_v23, %v78_v18  ;;  %v113_v36 = vmul.f32 %v109_v29, %v107_v19 }
  0x89   :  { %v91_v42 = vadd.f32 %v87_v34, %v66_v33  ;;  %v117_v47 = vadd.f32 %v113_v36, %v92_v41 }
  0x8b   :  { %v99_v22 = vpop.permute.xlu2 %98 }
  0x8c   :  { %v111_v38 = vmul.f32 %v109_v29, %v99_v22 }
  0x8f   :  { %v103_v26 = vpop.permute.xlu0 %102  ;;  %v54_v27 = vpop.permute.xlu1 %53 }
  0x90   :  { %v65_v31 = vadd.f32 %v54_v27, %v45_v25  ;;  %v112_v37 = vmul.f32 %v109_v29, %v103_v26 }
  0x92   :  { %v90_v39 = vadd.f32 %v86_v30, %v65_v31  ;;  %v116_v44 = vadd.f32 %v112_v37, %v91_v42 }
  0x94   :  { %v124_v43 = vpop.permute.xlu2 %123  ;;  %v115_v51 = vadd.f32 %v111_v38, %v90_v39 }
  0x95   :  { %v136_v48 = vmul.f32 %v134_v40, %v124_v43 }
  0x97   :  { %v140_v56 = vadd.f32 %v136_v48, %v115_v51 }
  0x98   :  { %v128_v45 = vpop.permute.xlu0 %127  ;;  %v132_v46 = vpop.permute.xlu1 %131 }
  0x99   :  { %v137_v49 = vmul.f32 %v134_v40, %v128_v45  ;;  %v138_v50 = vmul.f32 %v134_v40, %v132_v46  ;;  %v144_v59 = vmax.f32 %v140_v56, 0.0 }
  0x9b   :  { %v142_v52 = vadd.f32 %v138_v50, %v117_v47  ;;  %v141_v53 = vadd.f32 %v137_v49, %v116_v44 }
  0x9d   :  { %v146_v55 = vmax.f32 %v142_v52, 0.0  ;;  %v145_v57 = vmax.f32 %v141_v53, 0.0  ;;  %v152_v8 = vpop.permute.xlu2 %151 }
  0x9f   :  { %170 = vmatpush.msra.mxu0 %v146_v55 }
  0xa1   :  { %v70_v58 = vpop.permute.xlu1 %69  ;;  %171 = vmatpush.msra.mxu0 %v145_v57 }
  0xa2   :  { %v85_v62 = vmul.f32 %v84_v23, %v70_v58 }
  0xa3   :  { %172 = vmatpush.msra.mxu0 %v144_v59 }
  0xa4   :  { %v89_v1 = vadd.f32 %v85_v62, %v64_v63 }
  0xaa   :  { %v95_v60 = vpop.permute.xlu1 %94 }
  0xab   :  { %v110_v0 = vmul.f32 %v109_v29, %v95_v60 }
  0xad   :  { %v114_v3 = vadd.f32 %v110_v0, %v89_v1 }
  0xb3   :  { %v120_v2 = vpop.permute.xlu1 %119 }
  0xb4   :  { %v135_v4 = vmul.f32 %v134_v40, %v120_v2 }
  0xb6   :  { %v139_v5 = vadd.f32 %v135_v4, %v114_v3 }
  0xb8   :  { %v143_v6 = vmax.f32 %v139_v5, 0.0 }
  0xba   :  { %173 = vmatpush.msra.mxu0 %v143_v6 }
  0xbb   :  { %205 = vmatmul.msk.f32.vlgmr.msra.gmra.mxu0 %vm154_vm0, %v147_v7 }
 0x138   :  { %v175_v9 = vpop.f32.mrf.mxu0 }
 0x139   :  { %v176_v10 = vadd.f32 %v175_v9, %v152_v8 }
 0x13b   :  { %v179_v11 = vrot.slane %v176_v10, 1  ;;  %v183_v12 = vperm.slane %v176_v10, 0 }
 0x13d   :  { %v181_v13 = vadd.f32 %v179_v11, %v176_v10  ;;  %v184_v15 = vadd.f32 %v183_v12, %v176_v10 }
 0x13f   :  { %v182_v14 = vmul.f32 0.5, %v181_v13 }
 0x141   :  { %v185_v16 = vperm.slane %v182_v14, 1 }
 0x143   :  { %v186_v17 = vsub.f32 %v184_v15, %v185_v16 }
 0x145   :  { %188 = vst.msk [vmem:[#allocation2 - $0x1] sm:$0x6] %vm187_vm1, %v186_v17 }
 0x146   :  { %199 = dma.vmem_to_hbm [thread:$0]  %s195_s27, 32, %s197_s30, [#allocation3]  }
 0x147   :  { %257 = dma.done.wait [#allocation3], 32  }
 0x148   :  { %258 = vsyncadd [#allocation3], 4294967264 }
 0x149   :  { %204 = vsyncpa [#allocation3], 1 }

</bundles_post_ra>
